<compile_context>
chip_gen: v6e
topology: v6e:2x2x1
jax: 0.10.0
libtpu: 0.0.40
codegen_flags: <defaults>
</compile_context>

<pallas_src>
import functools

import jax
import jax.numpy as jnp
import numpy as np
from jax.experimental import pallas as pl
from jax.experimental.pallas import tpu as pltpu

_PARTITIONS = ("odd", "even", "odd", "even")   # NICEModel coupling-layer order


# --------------------------------------------------------------------------- #
# Kernel: whole NICE forward on one feature-major [D, TB] batch tile.
# --------------------------------------------------------------------------- #
def _nice_kernel(n_linear, x_ref, s_ref, *refs):
    """refs = W_0..W_{n_linear-1}  ([4, fan_out, fan_in], pre-transposed, even/odd
               gather/scatter already folded into the first/last Linear),
              b_0..b_{n_linear-1}  ([4, fan_out, 1], f32),
              z_out_ref            ([D, TB], f32).
    """
    w_refs = refs[:n_linear]
    b_refs = refs[n_linear:2 * n_linear]
    z_ref = refs[2 * n_linear]

    z = x_ref[...]                                   # [D, TB] f32, batch along lanes
    for c in range(4):                               # 4 coupling layers, static unroll
        h = z
        for li in range(n_linear):
            w = w_refs[li][c]                        # [fan_out, fan_in]
            b = b_refs[li][c]                        # [fan_out, 1]  (lane broadcast)
            # matmul in the weights' dtype (bf16 on v6e/v7x path), f32 accumulation
            h = jnp.dot(w, h.astype(w.dtype), preferred_element_type=jnp.float32) + b
            if li < n_linear - 1:                    # ReLU after every Linear but last
                h = jnp.maximum(h, 0.0)
        z = z + h                 # additive update; non-target lanes get an exact +0
    z_ref[...] = z * s_ref[...]                      # z * exp(scalingParameter)


# --------------------------------------------------------------------------- #
# Parameter construction (mirrors nn.Linear default init; deterministic)
# --------------------------------------------------------------------------- #
def init_params(key, input_dim, hidden_sizes):
    """4 MLPs, each: D/2 -> hidden_sizes... -> D/2.  Returns list-of-4 layers of
    (W [fan_in, fan_out], b [fan_out]) plus the scaling parameter (ones)."""
    half = input_dim // 2
    dims = [half] + list(hidden_sizes) + [half]
    params = []
    for _layer in range(4):
        layer = []
        for i in range(len(dims) - 1):
            fan_in, fan_out = dims[i], dims[i + 1]
            key, kw, kb = jax.random.split(key, 3)
            bound = 1.0 / float(np.sqrt(fan_in))
            w = jax.random.uniform(kw, (fan_in, fan_out), jnp.float32, -bound, bound)
            b = jax.random.uniform(kb, (fan_out,), jnp.float32, -bound, bound)
            layer.append((w, b))
        params.append(layer)
    scaling = jnp.ones((input_dim,), jnp.float32)
    return params, scaling


# --------------------------------------------------------------------------- #
# One-time preprocessing: fold even/odd gather/scatter, pre-transpose, stack, exp
# --------------------------------------------------------------------------- #
def prepare_params(params, scaling, *, compute_dtype=jnp.float32):
    """Fold each coupling layer's even/odd gather (MLP input) and scatter (additive
    target) into its first / last Linear (exact identity), transpose every W for the
    feature-major kernel layout, and stack the 4 coupling layers per linear position.
    Done once per model — the per-call forward is a single custom call."""
    D = scaling.shape[0]
    even_idx = np.arange(0, D, 2)
    odd_idx = np.arange(1, D, 2)
    n_linear = len(params[0])

    w_stk, b_stk = [], []
    for li in range(n_linear):
        w_c, b_c = [], []
        for layer_params, part in zip(params, _PARTITIONS):
            w, b = layer_params[li]
            # partition 'odd': mlp reads odd lanes, updates even lanes (and vice versa)
            src = odd_idx if part == "odd" else even_idx
            dst = even_idx if part == "odd" else odd_idx
            if li == 0:                 # gather fold: W rows at source lane positions
                w = jnp.zeros((D, w.shape[1]), w.dtype).at[src, :].set(w)
            if li == n_linear - 1:      # scatter fold: W cols / bias at target lanes
                w = jnp.zeros((w.shape[0], D), w.dtype).at[:, dst].set(w)
                b = jnp.zeros((D,), b.dtype).at[dst].set(b)
            w_c.append(w.T)             # pre-transposed: [fan_out, fan_in]
            b_c.append(b.reshape(-1, 1))
        w_stk.append(jnp.stack(w_c, axis=0).astype(compute_dtype))
        b_stk.append(jnp.stack(b_c, axis=0).astype(jnp.float32))

    exp_s = jnp.exp(scaling).reshape(D, 1).astype(jnp.float32)   # exp hoisted
    return tuple(w_stk), tuple(b_stk), exp_s


def _pick_tb(B):
    """Lane-tile (batch) size for the feature-major layout."""
    if B < 256:
        return B               # single tile; block == full lane dim (any B allowed)
    # multiple-of-128 lane tiles; keep >= 2 grid steps so both v7x TensorCores get
    # work, but grow tiles (up to 2048 lanes) to amortize per-step overhead.
    half = -(-B // 2)
    tb = -(-half // 128) * 128
    return min(tb, 2048)


# --------------------------------------------------------------------------- #
# Forward wrapper (jitted): transpose -> one pallas_call -> transpose back
# --------------------------------------------------------------------------- #
@jax.jit
def nice_forward(x, packed):
    w_stk, b_stk, exp_s = packed
    B, D = x.shape
    n_linear = len(w_stk)

    TB = _pick_tb(B)
    grid = (pl.cdiv(B, TB),)       # ragged last tile handled by masked OOB writes
    xt = x.T                       # feature-major [D, B]; batch along lanes

    x_spec = pl.BlockSpec((D, TB), lambda i: (0, i))
    s_spec = pl.BlockSpec((D, 1), lambda i: (0, 0))
    w_specs = [pl.BlockSpec(w.shape, lambda i: (0, 0, 0)) for w in w_stk]
    b_specs = [pl.BlockSpec(b.shape, lambda i: (0, 0, 0)) for b in b_stk]

    # Explicit VMEM budget: double-buffered x/out tiles + (double-buffered) params
    # + headroom; clamped to [16 MiB, 64 MiB] (v7x physical VMEM is 64 MiB).
    def _nbytes(a):
        return int(np.prod(a.shape)) * a.dtype.itemsize
    budget = (2 * 2 * D * TB * 4
              + 2 * sum(_nbytes(w) for w in w_stk)
              + 2 * sum(_nbytes(b) for b in b_stk)
              + 2 * D * 4
              + (8 << 20))
    vmem_limit = int(min(max(budget, 16 << 20), 64 << 20))

    kernel = functools.partial(_nice_kernel, n_linear)
    zt = pl.pallas_call(
        kernel,
        grid=grid,
        in_specs=[x_spec, s_spec] + w_specs + b_specs,
        out_specs=x_spec,
        out_shape=jax.ShapeDtypeStruct((D, B), jnp.float32),
        compiler_params=pltpu.CompilerParams(
            dimension_semantics=("parallel",),
            vmem_limit_bytes=vmem_limit),
    )(xt, exp_s, *w_stk, *b_stk)

    return zt.T                    # back to the module's [B, D] layout


# --------------------------------------------------------------------------- #
# Pure-JAX reference mirroring the PyTorch layer-by-layer forward
# --------------------------------------------------------------------------- #
def nice_forward_ref(x, params, scaling):
    z = x
    for layer_params, part in zip(params, _PARTITIONS):
        even, odd = z[:, 0::2], z[:, 1::2]
        h = odd if part == "odd" else even
        n = len(layer_params)
        for li, (w, b) in enumerate(layer_params):
            h = h @ w + b
            if li < n - 1:
                h = jnp.maximum(h, 0.0)
        if part == "odd":
            even = even + h
        else:
            odd = odd + h
        z = jnp.stack([even, odd], axis=-1).reshape(z.shape)
    return z * jnp.exp(scaling)


# --------------------------------------------------------------------------- #
if __name__ == "__main__":
    key = jax.random.PRNGKey(0)

    # cfg 0: toy shapes implied by the module (input_dim=16, hidden=[32], B=8),
    #        single-tile path, f32 weights -> tight check against the f32 reference.
    # cfg 1: ragged batch > 256 -> 2-step "parallel" grid with a masked partial
    #        lane tile, bf16 matmul operands -> loose check against the f32 reference.
    configs = [
        (8,   16, [32],     jnp.float32,  1e-4, 1e-4),
        (300, 16, [64, 32], jnp.bfloat16, 3e-2, 3e-2),
    ]
    for B, D, hidden_sizes, compute_dtype, rtol, atol in configs:
        key, kx, kp = jax.random.split(key, 3)
        x = jax.random.normal(kx, (B, D), jnp.float32)
        params, scaling = init_params(kp, D, hidden_sizes)
        packed = prepare_params(params, scaling, compute_dtype=compute_dtype)

        z = jax.block_until_ready(nice_forward(x, packed))
        z_ref = nice_forward_ref(x, params, scaling)
        np.testing.assert_allclose(np.asarray(z), np.asarray(z_ref),
                                   rtol=rtol, atol=atol)

    print("KERNEL_OK")
</pallas_src>

<mosaic_0001>
module attributes {stable_mosaic.version = 11 : i64} {
  func.func @_nice_kernel(%arg0: i32, %arg1: memref<16x8xf32, #tpu.memory_space<vmem>>, %arg2: memref<16x1xf32, #tpu.memory_space<vmem>>, %arg3: memref<4x32x16xf32, #tpu.memory_space<vmem>>, %arg4: memref<4x16x32xf32, #tpu.memory_space<vmem>>, %arg5: memref<4x32x1xf32, #tpu.memory_space<vmem>>, %arg6: memref<4x16x1xf32, #tpu.memory_space<vmem>>, %arg7: memref<16x8xf32, #tpu.memory_space<vmem>>) attributes {dimension_semantics = [#tpu.dimension_semantics<parallel>], iteration_bounds = array<i64: 1>, scalar_prefetch = 0 : i64, scratch_operands = 0 : i64, tpu.core_type = #tpu.core_type<tc>, window_params = [{transform_indices = @transform_0, window_bounds = array<i64: 16, 8>}, {pipeline_mode = #tpu.pipeline_mode<synchronous>, transform_indices = @transform_1, window_bounds = array<i64: 16, 1>}, {pipeline_mode = #tpu.pipeline_mode<synchronous>, transform_indices = @transform_2, window_bounds = array<i64: 4, 32, 16>}, {pipeline_mode = #tpu.pipeline_mode<synchronous>, transform_indices = @transform_3, window_bounds = array<i64: 4, 16, 32>}, {pipeline_mode = #tpu.pipeline_mode<synchronous>, transform_indices = @transform_4, window_bounds = array<i64: 4, 32, 1>}, {pipeline_mode = #tpu.pipeline_mode<synchronous>, transform_indices = @transform_5, window_bounds = array<i64: 4, 16, 1>}, {transform_indices = @transform_6, window_bounds = array<i64: 16, 8>}]} {
    %c0 = arith.constant 0 : index
    %c0_0 = arith.constant 0 : index
    %0 = vector.load %arg1[%c0, %c0_0] : memref<16x8xf32, #tpu.memory_space<vmem>>, vector<16x8xf32>
    %c0_1 = arith.constant 0 : index
    %c0_2 = arith.constant 0 : index
    %c0_3 = arith.constant 0 : index
    %1 = vector.load %arg3[%c0_1, %c0_2, %c0_3] : memref<4x32x16xf32, #tpu.memory_space<vmem>>, vector<1x32x16xf32>
    %2 = vector.shape_cast %1 : vector<1x32x16xf32> to vector<32x16xf32>
    %c0_4 = arith.constant 0 : index
    %c0_5 = arith.constant 0 : index
    %c0_6 = arith.constant 0 : index
    %3 = vector.load %arg5[%c0_4, %c0_5, %c0_6] : memref<4x32x1xf32, #tpu.memory_space<vmem>>, vector<1x32x1xf32>
    %4 = vector.shape_cast %3 : vector<1x32x1xf32> to vector<32x1xf32>
    %cst = arith.constant dense<0.000000e+00> : vector<32x8xf32>
    %5 = tpu.matmul %2, %0, %cst {dimension_numbers = #tpu.dot_dimension_numbers<[1], [0], [0], [1], [0, 0, 1, 1], [], []>} : vector<32x16xf32>, vector<16x8xf32>, vector<32x8xf32> -> vector<32x8xf32>
    %6 = vector.broadcast %4 : vector<32x1xf32> to vector<32x8xf32>
    %7 = arith.addf %5, %6 : vector<32x8xf32>
    %cst_7 = arith.constant 0.000000e+00 : f32
    %8 = vector.broadcast %cst_7 : f32 to vector<32x8xf32>
    %9 = arith.maximumf %7, %8 : vector<32x8xf32>
    %c0_8 = arith.constant 0 : index
    %c0_9 = arith.constant 0 : index
    %c0_10 = arith.constant 0 : index
    %10 = vector.load %arg4[%c0_8, %c0_9, %c0_10] : memref<4x16x32xf32, #tpu.memory_space<vmem>>, vector<1x16x32xf32>
    %11 = vector.shape_cast %10 : vector<1x16x32xf32> to vector<16x32xf32>
    %c0_11 = arith.constant 0 : index
    %c0_12 = arith.constant 0 : index
    %c0_13 = arith.constant 0 : index
    %12 = vector.load %arg6[%c0_11, %c0_12, %c0_13] : memref<4x16x1xf32, #tpu.memory_space<vmem>>, vector<1x16x1xf32>
    %13 = vector.shape_cast %12 : vector<1x16x1xf32> to vector<16x1xf32>
    %cst_14 = arith.constant dense<0.000000e+00> : vector<16x8xf32>
    %14 = tpu.matmul %11, %9, %cst_14 {dimension_numbers = #tpu.dot_dimension_numbers<[1], [0], [0], [1], [0, 0, 1, 1], [], []>} : vector<16x32xf32>, vector<32x8xf32>, vector<16x8xf32> -> vector<16x8xf32>
    %15 = vector.broadcast %13 : vector<16x1xf32> to vector<16x8xf32>
    %16 = arith.addf %14, %15 : vector<16x8xf32>
    %17 = arith.addf %0, %16 : vector<16x8xf32>
    %c1 = arith.constant 1 : index
    %c0_15 = arith.constant 0 : index
    %c0_16 = arith.constant 0 : index
    %18 = vector.load %arg3[%c1, %c0_15, %c0_16] : memref<4x32x16xf32, #tpu.memory_space<vmem>>, vector<1x32x16xf32>
    %19 = vector.shape_cast %18 : vector<1x32x16xf32> to vector<32x16xf32>
    %c1_17 = arith.constant 1 : index
    %c0_18 = arith.constant 0 : index
    %c0_19 = arith.constant 0 : index
    %20 = vector.load %arg5[%c1_17, %c0_18, %c0_19] : memref<4x32x1xf32, #tpu.memory_space<vmem>>, vector<1x32x1xf32>
    %21 = vector.shape_cast %20 : vector<1x32x1xf32> to vector<32x1xf32>
    %cst_20 = arith.constant dense<0.000000e+00> : vector<32x8xf32>
    %22 = tpu.matmul %19, %17, %cst_20 {dimension_numbers = #tpu.dot_dimension_numbers<[1], [0], [0], [1], [0, 0, 1, 1], [], []>} : vector<32x16xf32>, vector<16x8xf32>, vector<32x8xf32> -> vector<32x8xf32>
    %23 = vector.broadcast %21 : vector<32x1xf32> to vector<32x8xf32>
    %24 = arith.addf %22, %23 : vector<32x8xf32>
    %cst_21 = arith.constant 0.000000e+00 : f32
    %25 = vector.broadcast %cst_21 : f32 to vector<32x8xf32>
    %26 = arith.maximumf %24, %25 : vector<32x8xf32>
    %c1_22 = arith.constant 1 : index
    %c0_23 = arith.constant 0 : index
    %c0_24 = arith.constant 0 : index
    %27 = vector.load %arg4[%c1_22, %c0_23, %c0_24] : memref<4x16x32xf32, #tpu.memory_space<vmem>>, vector<1x16x32xf32>
    %28 = vector.shape_cast %27 : vector<1x16x32xf32> to vector<16x32xf32>
    %c1_25 = arith.constant 1 : index
    %c0_26 = arith.constant 0 : index
    %c0_27 = arith.constant 0 : index
    %29 = vector.load %arg6[%c1_25, %c0_26, %c0_27] : memref<4x16x1xf32, #tpu.memory_space<vmem>>, vector<1x16x1xf32>
    %30 = vector.shape_cast %29 : vector<1x16x1xf32> to vector<16x1xf32>
    %cst_28 = arith.constant dense<0.000000e+00> : vector<16x8xf32>
    %31 = tpu.matmul %28, %26, %cst_28 {dimension_numbers = #tpu.dot_dimension_numbers<[1], [0], [0], [1], [0, 0, 1, 1], [], []>} : vector<16x32xf32>, vector<32x8xf32>, vector<16x8xf32> -> vector<16x8xf32>
    %32 = vector.broadcast %30 : vector<16x1xf32> to vector<16x8xf32>
    %33 = arith.addf %31, %32 : vector<16x8xf32>
    %34 = arith.addf %17, %33 : vector<16x8xf32>
    %c2 = arith.constant 2 : index
    %c0_29 = arith.constant 0 : index
    %c0_30 = arith.constant 0 : index
    %35 = vector.load %arg3[%c2, %c0_29, %c0_30] : memref<4x32x16xf32, #tpu.memory_space<vmem>>, vector<1x32x16xf32>
    %36 = vector.shape_cast %35 : vector<1x32x16xf32> to vector<32x16xf32>
    %c2_31 = arith.constant 2 : index
    %c0_32 = arith.constant 0 : index
    %c0_33 = arith.constant 0 : index
    %37 = vector.load %arg5[%c2_31, %c0_32, %c0_33] : memref<4x32x1xf32, #tpu.memory_space<vmem>>, vector<1x32x1xf32>
    %38 = vector.shape_cast %37 : vector<1x32x1xf32> to vector<32x1xf32>
    %cst_34 = arith.constant dense<0.000000e+00> : vector<32x8xf32>
    %39 = tpu.matmul %36, %34, %cst_34 {dimension_numbers = #tpu.dot_dimension_numbers<[1], [0], [0], [1], [0, 0, 1, 1], [], []>} : vector<32x16xf32>, vector<16x8xf32>, vector<32x8xf32> -> vector<32x8xf32>
    %40 = vector.broadcast %38 : vector<32x1xf32> to vector<32x8xf32>
    %41 = arith.addf %39, %40 : vector<32x8xf32>
    %cst_35 = arith.constant 0.000000e+00 : f32
    %42 = vector.broadcast %cst_35 : f32 to vector<32x8xf32>
    %43 = arith.maximumf %41, %42 : vector<32x8xf32>
    %c2_36 = arith.constant 2 : index
    %c0_37 = arith.constant 0 : index
    %c0_38 = arith.constant 0 : index
    %44 = vector.load %arg4[%c2_36, %c0_37, %c0_38] : memref<4x16x32xf32, #tpu.memory_space<vmem>>, vector<1x16x32xf32>
    %45 = vector.shape_cast %44 : vector<1x16x32xf32> to vector<16x32xf32>
    %c2_39 = arith.constant 2 : index
    %c0_40 = arith.constant 0 : index
    %c0_41 = arith.constant 0 : index
    %46 = vector.load %arg6[%c2_39, %c0_40, %c0_41] : memref<4x16x1xf32, #tpu.memory_space<vmem>>, vector<1x16x1xf32>
    %47 = vector.shape_cast %46 : vector<1x16x1xf32> to vector<16x1xf32>
    %cst_42 = arith.constant dense<0.000000e+00> : vector<16x8xf32>
    %48 = tpu.matmul %45, %43, %cst_42 {dimension_numbers = #tpu.dot_dimension_numbers<[1], [0], [0], [1], [0, 0, 1, 1], [], []>} : vector<16x32xf32>, vector<32x8xf32>, vector<16x8xf32> -> vector<16x8xf32>
    %49 = vector.broadcast %47 : vector<16x1xf32> to vector<16x8xf32>
    %50 = arith.addf %48, %49 : vector<16x8xf32>
    %51 = arith.addf %34, %50 : vector<16x8xf32>
    %c3 = arith.constant 3 : index
    %c0_43 = arith.constant 0 : index
    %c0_44 = arith.constant 0 : index
    %52 = vector.load %arg3[%c3, %c0_43, %c0_44] : memref<4x32x16xf32, #tpu.memory_space<vmem>>, vector<1x32x16xf32>
    %53 = vector.shape_cast %52 : vector<1x32x16xf32> to vector<32x16xf32>
    %c3_45 = arith.constant 3 : index
    %c0_46 = arith.constant 0 : index
    %c0_47 = arith.constant 0 : index
    %54 = vector.load %arg5[%c3_45, %c0_46, %c0_47] : memref<4x32x1xf32, #tpu.memory_space<vmem>>, vector<1x32x1xf32>
    %55 = vector.shape_cast %54 : vector<1x32x1xf32> to vector<32x1xf32>
    %cst_48 = arith.constant dense<0.000000e+00> : vector<32x8xf32>
    %56 = tpu.matmul %53, %51, %cst_48 {dimension_numbers = #tpu.dot_dimension_numbers<[1], [0], [0], [1], [0, 0, 1, 1], [], []>} : vector<32x16xf32>, vector<16x8xf32>, vector<32x8xf32> -> vector<32x8xf32>
    %57 = vector.broadcast %55 : vector<32x1xf32> to vector<32x8xf32>
    %58 = arith.addf %56, %57 : vector<32x8xf32>
    %cst_49 = arith.constant 0.000000e+00 : f32
    %59 = vector.broadcast %cst_49 : f32 to vector<32x8xf32>
    %60 = arith.maximumf %58, %59 : vector<32x8xf32>
    %c3_50 = arith.constant 3 : index
    %c0_51 = arith.constant 0 : index
    %c0_52 = arith.constant 0 : index
    %61 = vector.load %arg4[%c3_50, %c0_51, %c0_52] : memref<4x16x32xf32, #tpu.memory_space<vmem>>, vector<1x16x32xf32>
    %62 = vector.shape_cast %61 : vector<1x16x32xf32> to vector<16x32xf32>
    %c3_53 = arith.constant 3 : index
    %c0_54 = arith.constant 0 : index
    %c0_55 = arith.constant 0 : index
    %63 = vector.load %arg6[%c3_53, %c0_54, %c0_55] : memref<4x16x1xf32, #tpu.memory_space<vmem>>, vector<1x16x1xf32>
    %64 = vector.shape_cast %63 : vector<1x16x1xf32> to vector<16x1xf32>
    %cst_56 = arith.constant dense<0.000000e+00> : vector<16x8xf32>
    %65 = tpu.matmul %62, %60, %cst_56 {dimension_numbers = #tpu.dot_dimension_numbers<[1], [0], [0], [1], [0, 0, 1, 1], [], []>} : vector<16x32xf32>, vector<32x8xf32>, vector<16x8xf32> -> vector<16x8xf32>
    %66 = vector.broadcast %64 : vector<16x1xf32> to vector<16x8xf32>
    %67 = arith.addf %65, %66 : vector<16x8xf32>
    %68 = arith.addf %51, %67 : vector<16x8xf32>
    %c0_57 = arith.constant 0 : index
    %c0_58 = arith.constant 0 : index
    %69 = vector.load %arg2[%c0_57, %c0_58] : memref<16x1xf32, #tpu.memory_space<vmem>>, vector<16x1xf32>
    %70 = vector.broadcast %69 : vector<16x1xf32> to vector<16x8xf32>
    %71 = arith.mulf %68, %70 : vector<16x8xf32>
    %c0_59 = arith.constant 0 : index
    %c0_60 = arith.constant 0 : index
    %72 = vector.load %arg7[%c0_59, %c0_60] : memref<16x8xf32, #tpu.memory_space<vmem>>, vector<16x8xf32>
    tpu.vector_store %arg7[%c0_59, %c0_60], %71 {strides = array<i32>} : memref<16x8xf32, #tpu.memory_space<vmem>>, vector<16x8xf32>,
    return
  }
  func.func @transform_0(%arg0: i32) -> (i32, i32) {
    %c0_i32 = arith.constant 0 : i32
    %c0_i32_0 = arith.constant 0 : i32
    return %c0_i32, %arg0 : i32, i32
  }
  func.func @transform_1(%arg0: i32) -> (i32, i32) {
    %c0_i32 = arith.constant 0 : i32
    %c0_i32_0 = arith.constant 0 : i32
    %c0_i32_1 = arith.constant 0 : i32
    return %c0_i32, %c0_i32_0 : i32, i32
  }
  func.func @transform_2(%arg0: i32) -> (i32, i32, i32) {
    %c0_i32 = arith.constant 0 : i32
    %c0_i32_0 = arith.constant 0 : i32
    %c0_i32_1 = arith.constant 0 : i32
    %c0_i32_2 = arith.constant 0 : i32
    return %c0_i32, %c0_i32_0, %c0_i32_1 : i32, i32, i32
  }
  func.func @transform_3(%arg0: i32) -> (i32, i32, i32) {
    %c0_i32 = arith.constant 0 : i32
    %c0_i32_0 = arith.constant 0 : i32
    %c0_i32_1 = arith.constant 0 : i32
    %c0_i32_2 = arith.constant 0 : i32
    return %c0_i32, %c0_i32_0, %c0_i32_1 : i32, i32, i32
  }
  func.func @transform_4(%arg0: i32) -> (i32, i32, i32) {
    %c0_i32 = arith.constant 0 : i32
    %c0_i32_0 = arith.constant 0 : i32
    %c0_i32_1 = arith.constant 0 : i32
    %c0_i32_2 = arith.constant 0 : i32
    return %c0_i32, %c0_i32_0, %c0_i32_1 : i32, i32, i32
  }
  func.func @transform_5(%arg0: i32) -> (i32, i32, i32) {
    %c0_i32 = arith.constant 0 : i32
    %c0_i32_0 = arith.constant 0 : i32
    %c0_i32_1 = arith.constant 0 : i32
    %c0_i32_2 = arith.constant 0 : i32
    return %c0_i32, %c0_i32_0, %c0_i32_1 : i32, i32, i32
  }
  func.func @transform_6(%arg0: i32) -> (i32, i32) {
    %c0_i32 = arith.constant 0 : i32
    %c0_i32_0 = arith.constant 0 : i32
    return %c0_i32, %arg0 : i32, i32
  }
}

</mosaic_0001>

<bundles_post_ra>
// kernel: nice_forward.1
= control target key start
LH: loop header
LB: loop body
LE: loop exit
PB: predicated region body
PF: predicated region fallthrough
CT: control target
= control target key end

     0   :  { %vm53_vm0 = vcmask 130048   ;;  %v1159_v3 = vmov 0   ;;  %vm169_vm1 = vcmask 261120   ;;  %vm957_vm2 = vcmask 64512   ;;  %s1391_s0 = inlined_call_operand.vmem [shape: f32[16,8], index: 0, kind: input, shape index: {}]   ;;  %s1392_s2 = inlined_call_operand.vmem [shape: f32[4,32,16], index: 2, kind: input, shape index: {}]   ;;  %s1393_s4 = inlined_call_operand.vmem [shape: f32[4,32,1], index: 4, kind: input, shape index: {}]   ;;  %s1394_s5 = inlined_call_operand.vmem [shape: f32[4,16,1], index: 5, kind: input, shape index: {}]   ;;  %s1395_s1 = inlined_call_operand.vmem [shape: f32[16,1], index: 1, kind: input, shape index: {}]   ;;  %s1396_s3 = inlined_call_operand.vmem [shape: f32[4,16,32], index: 3, kind: input, shape index: {}]   ;;  %s1397_s6 = inlined_call_operand.vmem [shape: f32[16,8], index: 6, kind: output, shape index: {}]  }
   0x1   :  { %v1198_v0 = vld [vmem:[%s1391_s0 + $0x8] sm:$0xff]  ;;  %v1203_v1 = vld [vmem:[%s1391_s0] sm:$0xff]  ;;  %1157 = vset.pattern.permute.xlu0 %v1159_v3  ;;  %1158 = vset.pattern.permute.xlu1 %v1159_v3  ;;  %v32_v5 = vld [vmem:[%s1393_s4 + $0x18] sm:$0xff] }
   0x2   :  { %v25_v2 = vld [vmem:[%s1392_s2] sm:$0xff]  ;;  %1072 = vmatprep.subr.mxu0 %v1198_v0  ;;  %v26_v4 = vld [vmem:[%s1392_s2 + $0x8] sm:$0xff]  ;;  %v27_v7 = vld [vmem:[%s1392_s2 + $0x10] sm:$0xff]  ;;  %50 = vperm.xlu0 %1157, %v32_v5  }
   0x3   :  { %1076 = vmatprep.mubr.msk.f32.mxu0 %vm53_vm0, %v25_v2  ;;  %1073 = vmatpush3.msra.mxu0 %v1198_v0  ;;  %v30_v6 = vld [vmem:[%s1393_s4 + $0x8] sm:$0xff]  ;;  %v31_v8 = vld [vmem:[%s1393_s4 + $0x10] sm:$0xff]  ;;  %v29_v9 = vld [vmem:[%s1393_s4] sm:$0xff] }
   0x4   :  { %1074 = vmatprep.subr.mxu0 %v1203_v1  ;;  %40 = vperm.xlu1 %1158, %v30_v6   ;;  %v28_v10 = vld [vmem:[%s1392_s2 + $0x18] sm:$0xff]  ;;  %v158_v11 = vld [vmem:[%s1394_s5 + $0x8] sm:$0xff]  ;;  %v157_v12 = vld [vmem:[%s1394_s5] sm:$0xff] }
   0x5   :  { %1075 = vmatpush3.msra.mxu0 %v1203_v1  ;;  %v977_v13 = vld [vmem:[%s1393_s4 + $0x38] sm:$0xff]  ;;  %v976_v14 = vld [vmem:[%s1393_s4 + $0x30] sm:$0xff]  ;;  %v975_v15 = vld [vmem:[%s1393_s4 + $0x28] sm:$0xff] }
   0x6   :  { %1077 = vmatmul.mubr.msk.f32.vlgmr.msra.gmra.mxu0 %vm53_vm0, %v26_v4  ;;  %45 = vperm.xlu0 %1157, %v31_v8   ;;  %v974_v16 = vld [vmem:[%s1393_s4 + $0x20] sm:$0xff]  ;;  %v985_v17 = vld [vmem:[%s1394_s5 + $0x18] sm:$0xff]  ;;  %v984_v18 = vld [vmem:[%s1394_s5 + $0x10] sm:$0xff] }
   0x7   :  { %1079 = vmatprep.mubr.msk.f32.mxu0 %vm53_vm0, %v27_v7  ;;  %v995_v19 = vld [vmem:[%s1393_s4 + $0x58] sm:$0xff]  ;;  %v994_v20 = vld [vmem:[%s1393_s4 + $0x50] sm:$0xff]  ;;  %v993_v21 = vld [vmem:[%s1393_s4 + $0x48] sm:$0xff] }
   0x8   :  { %35 = vperm.xlu1 %1158, %v29_v9   ;;  %v992_v22 = vld [vmem:[%s1393_s4 + $0x40] sm:$0xff]  ;;  %v1003_v23 = vld [vmem:[%s1394_s5 + $0x28] sm:$0xff]  ;;  %v1013_v25 = vld [vmem:[%s1393_s4 + $0x78] sm:$0xff] }
   0x9   :  { %v1002_v24 = vld [vmem:[%s1394_s5 + $0x20] sm:$0xff]  ;;  %v1012_v26 = vld [vmem:[%s1393_s4 + $0x70] sm:$0xff]  ;;  %v1011_v27 = vld [vmem:[%s1393_s4 + $0x68] sm:$0xff] }
   0xa   :  { %1080 = vmatmul.mubr.msk.f32.gmra.mxu0 %vm53_vm0, %v28_v10  ;;  %166 = vperm.xlu0 %1157, %v158_v11   ;;  %v1010_v28 = vld [vmem:[%s1393_s4 + $0x60] sm:$0xff]  ;;  %v1020_v29 = vld [vmem:[%s1394_s5 + $0x30] sm:$0xff]  ;;  %v1021_v30 = vld [vmem:[%s1394_s5 + $0x38] sm:$0xff] }
   0xb   :  { %v943_v31 = vld [vmem:[%s1395_s1] sm:$0xff]  ;;  %v944_v32 = vld [vmem:[%s1395_s1 + $0x8] sm:$0xff]  ;;  %v972_v61 = vld [vmem:[%s1392_s2 + $0x30] sm:$0xff] }
   0xc   :  { %161 = vperm.xlu1 %1158, %v157_v12   ;;  %v155_v33 = vld [vmem:[%s1396_s3] sm:$0xff]  ;;  %v156_v50 = vld [vmem:[%s1396_s3 + $0x8] sm:$0xff]  ;;  %v973_v62 = vld [vmem:[%s1392_s2 + $0x38] sm:$0xff] }
   0xd   :  { %1090 = vmatprep.mubr.msk.f32.mxu1 %vm169_vm1, %v155_v33  ;;  %v970_v51 = vld [vmem:[%s1392_s2 + $0x20] sm:$0xff]  ;;  %v971_v60 = vld [vmem:[%s1392_s2 + $0x28] sm:$0xff]  ;;  %v982_v63 = vld [vmem:[%s1396_s3 + $0x10] sm:$0xff] }
   0xe   :  { %280 = vperm.xlu0 %1157, %v977_v13   ;;  %1097 = vmatprep.mubr.msk.f32.mxu0 %vm53_vm0, %v970_v51 }
  0x10   :  { %275 = vperm.xlu1 %1158, %v976_v14  }
  0x12   :  { %270 = vperm.xlu0 %1157, %v975_v15  }
  0x14   :  { %265 = vperm.xlu1 %1158, %v974_v16   ;;  %v983_v16 = vld [vmem:[%s1396_s3 + $0x18] sm:$0xff] }
  0x16   :  { %397 = vperm.xlu0 %1157, %v985_v17   ;;  %v988_v17 = vld [vmem:[%s1392_s2 + $0x40] sm:$0xff] }
  0x18   :  { %392 = vperm.xlu1 %1158, %v984_v18  }
  0x1a   :  { %510 = vperm.xlu0 %1157, %v995_v19  }
  0x1c   :  { %505 = vperm.xlu1 %1158, %v994_v20  }
  0x1e   :  { %500 = vperm.xlu0 %1157, %v993_v21  }
  0x20   :  { %495 = vperm.xlu1 %1158, %v992_v22  }
  0x22   :  { %627 = vperm.xlu0 %1157, %v1003_v23  }
  0x24   :  { %622 = vperm.xlu1 %1158, %v1002_v24  }
  0x26   :  { %740 = vperm.xlu0 %1157, %v1013_v25  }
  0x28   :  { %735 = vperm.xlu1 %1158, %v1012_v26   ;;  %v989_v26 = vld [vmem:[%s1392_s2 + $0x48] sm:$0xff] }
  0x2a   :  { %730 = vperm.xlu0 %1157, %v1011_v27   ;;  %v990_v27 = vld [vmem:[%s1392_s2 + $0x50] sm:$0xff] }
  0x2c   :  { %725 = vperm.xlu1 %1158, %v1010_v28   ;;  %v991_v28 = vld [vmem:[%s1392_s2 + $0x58] sm:$0xff] }
  0x2e   :  { %852 = vperm.xlu0 %1157, %v1020_v29   ;;  %v1000_v29 = vld [vmem:[%s1396_s3 + $0x20] sm:$0xff] }
  0x30   :  { %857 = vperm.xlu1 %1158, %v1021_v30  }
  0x32   :  { %947 = vperm.xlu0 %1157, %v943_v31  }
  0x34   :  { %952 = vperm.xlu1 %1158, %v944_v32  }
  0x7d   :  { %v51_v34 = vpop.permute.xlu0 %50 }
  0x7f   :  { %v41_v36 = vpop.permute.xlu1 %40 }
  0x81   :  { %v46_v40 = vpop.permute.xlu0 %45 }
  0x83   :  { %v36_v45 = vpop.permute.xlu1 %35 }
  0x85   :  { %v167_v52 = vpop.permute.xlu0 %166 }
  0x87   :  { %v162_v55 = vpop.permute.xlu1 %161 }
  0x8b   :  { %v276_v2 = vpop.permute.xlu1 %275 }
  0x8f   :  { %v266_v11 = vpop.permute.xlu1 %265 }
  0x93   :  { %v393_v21 = vpop.permute.xlu1 %392 }
  0x97   :  { %v506_v32 = vpop.permute.xlu1 %505 }
  0xc6   :  { %v1078_v35 = vpop.f32.mrf.mxu0 }
  0xc7   :  { %v138_v42 = vadd.f32 %v1078_v35, %v41_v36 }
  0xc8   :  { %v132_v37 = vpop.f32.mrf.mxu0 }
  0xc9   :  { %v133_v46 = vadd.f32 %v132_v37, %v36_v45  ;;  %v152_v48 = vmax.f32 %v138_v42, 0.0 }
  0xca   :  { %v1081_v38 = vpop.f32.mrf.mxu0 }
  0xcb   :  { %v148_v39 = vadd.f32 %v1081_v38, %v51_v34  ;;  %v151_v49 = vmax.f32 %v133_v46, 0.0  ;;  %v1001_v46 = vld [vmem:[%s1396_s3 + $0x28] sm:$0xff] }
  0xcc   :  { %v142_v41 = vpop.f32.mrf.mxu0 }
  0xcd   :  { %v154_v43 = vmax.f32 %v148_v39, 0.0  ;;  %v143_v44 = vadd.f32 %v142_v41, %v46_v40  ;;  %v496_v41 = vpop.permute.xlu1 %495 }
  0xcf   :  { %v153_v47 = vmax.f32 %v143_v44, 0.0  ;;  %1082 = vmatprep.subr.mxu1 %v154_v43 }
  0xd0   :  { %1083 = vmatpush3.msra.mxu1 %v154_v43 }
  0xd1   :  { %1084 = vmatprep.subr.mxu1 %v153_v47  ;;  %v623_v51 = vpop.permute.xlu1 %622 }
  0xd2   :  { %1085 = vmatpush3.msra.mxu1 %v153_v47  ;;  %v1006_v47 = vld [vmem:[%s1392_s2 + $0x60] sm:$0xff] }
  0xd3   :  { %1086 = vmatprep.subr.mxu1 %v152_v48 }
  0xd4   :  { %1087 = vmatpush3.msra.mxu1 %v152_v48 }
  0xd5   :  { %1088 = vmatprep.subr.mxu1 %v151_v49 }
  0xd6   :  { %1089 = vmatpush3.msra.mxu1 %v151_v49 }
  0xd7   :  { %1091 = vmatmul.mubr.msk.f32.vlgmr.msra.gmra.mxu1 %vm169_vm1, %v156_v50 }
  0xd8   :  { %1111 = vmatprep.mubr.msk.f32.mxu1 %vm169_vm1, %v982_v63 }
 0x197   :  { %v1092_v53 = vpop.f32.mrf.mxu1 }
 0x198   :  { %v248_v54 = vadd.f32 %v1092_v53, %v167_v52 }
 0x199   :  { %v242_v56 = vpop.f32.mrf.mxu1 }
 0x19a   :  { %v252_v57 = vadd.f32 %v248_v54, %v1198_v0  ;;  %v243_v58 = vadd.f32 %v242_v56, %v162_v55  ;;  %v281_v0 = vpop.permute.xlu0 %280  ;;  %v1007_v56 = vld [vmem:[%s1392_s2 + $0x68] sm:$0xff] }
 0x19c   :  { %v251_v59 = vadd.f32 %v243_v58, %v1203_v1  ;;  %1093 = vmatprep.subr.mxu0 %v252_v57  ;;  %v1009_v58 = vld [vmem:[%s1392_s2 + $0x78] sm:$0xff] }
 0x19d   :  { %1094 = vmatpush3.msra.mxu0 %v252_v57 }
 0x19e   :  { %1095 = vmatprep.subr.mxu0 %v251_v59  ;;  %v271_v6 = vpop.permute.xlu0 %270 }
 0x19f   :  { %1096 = vmatpush3.msra.mxu0 %v251_v59 }
 0x1a0   :  { %1098 = vmatmul.mubr.msk.f32.vlgmr.msra.gmra.mxu0 %vm53_vm0, %v971_v60 }
 0x1a1   :  { %1100 = vmatprep.mubr.msk.f32.mxu0 %vm53_vm0, %v972_v61 }
 0x1a2   :  { %v398_v18 = vpop.permute.xlu0 %397 }
 0x1a4   :  { %1101 = vmatmul.mubr.msk.f32.gmra.mxu0 %vm53_vm0, %v973_v62  ;;  %v736_v62 = vpop.permute.xlu1 %735 }
 0x1a5   :  { %1118 = vmatprep.mubr.msk.f32.mxu0 %vm53_vm0, %v988_v17 }
 0x1a6   :  { %v511_v30 = vpop.permute.xlu0 %510 }
 0x1aa   :  { %v501_v36 = vpop.permute.xlu0 %500 }
 0x1ae   :  { %v628_v48 = vpop.permute.xlu0 %627 }
 0x1b2   :  { %v741_v60 = vpop.permute.xlu0 %740 }
 0x260   :  { %v1099_v1 = vpop.f32.mrf.mxu0 }
 0x261   :  { %v367_v8 = vadd.f32 %v1099_v1, %v271_v6 }
 0x262   :  { %v361_v3 = vpop.f32.mrf.mxu0 }
 0x263   :  { %v362_v12 = vadd.f32 %v361_v3, %v266_v11  ;;  %v381_v14 = vmax.f32 %v367_v8, 0.0 }
 0x264   :  { %v1102_v4 = vpop.f32.mrf.mxu0 }
 0x265   :  { %v377_v5 = vadd.f32 %v1102_v4, %v281_v0  ;;  %v380_v15 = vmax.f32 %v362_v12, 0.0  ;;  %v1019_v12 = vld [vmem:[%s1396_s3 + $0x38] sm:$0xff] }
 0x266   :  { %v371_v7 = vpop.f32.mrf.mxu0 }
 0x267   :  { %v383_v9 = vmax.f32 %v377_v5, 0.0  ;;  %v372_v10 = vadd.f32 %v371_v7, %v276_v2  ;;  %v731_v2 = vpop.permute.xlu0 %730  ;;  %v726_v7 = vpop.permute.xlu1 %725 }
 0x269   :  { %v382_v13 = vmax.f32 %v372_v10, 0.0  ;;  %1103 = vmatprep.subr.mxu1 %v383_v9 }
 0x26a   :  { %1104 = vmatpush3.msra.mxu1 %v383_v9 }
 0x26b   :  { %1105 = vmatprep.subr.mxu1 %v382_v13 }
 0x26c   :  { %1106 = vmatpush3.msra.mxu1 %v382_v13  ;;  %v858_v13 = vpop.permute.xlu1 %857 }
 0x26d   :  { %1107 = vmatprep.subr.mxu1 %v381_v14 }
 0x26e   :  { %1108 = vmatpush3.msra.mxu1 %v381_v14  ;;  %v853_v14 = vpop.permute.xlu0 %852 }
 0x26f   :  { %1109 = vmatprep.subr.mxu1 %v380_v15 }
 0x270   :  { %1110 = vmatpush3.msra.mxu1 %v380_v15 }
 0x271   :  { %1112 = vmatmul.mubr.msk.f32.vlgmr.msra.gmra.mxu1 %vm169_vm1, %v983_v16 }
 0x272   :  { %1132 = vmatprep.mubr.msk.f32.mxu1 %vm169_vm1, %v1000_v29 }
 0x331   :  { %v1113_v19 = vpop.f32.mrf.mxu1 }
 0x332   :  { %v478_v20 = vadd.f32 %v1113_v19, %v398_v18 }
 0x333   :  { %v472_v22 = vpop.f32.mrf.mxu1 }
 0x334   :  { %v482_v23 = vadd.f32 %v478_v20, %v252_v57  ;;  %v473_v24 = vadd.f32 %v472_v22, %v393_v21  ;;  %v1008_v57 = vld [vmem:[%s1392_s2 + $0x70] sm:$0xff]  ;;  %v953_v20 = vpop.permute.xlu1 %952 }
 0x336   :  { %v481_v25 = vadd.f32 %v473_v24, %v251_v59  ;;  %1114 = vmatprep.subr.mxu0 %v482_v23  ;;  %v1018_v59 = vld [vmem:[%s1396_s3 + $0x30] sm:$0xff] }
 0x337   :  { %1115 = vmatpush3.msra.mxu0 %v482_v23 }
 0x338   :  { %1116 = vmatprep.subr.mxu0 %v481_v25 }
 0x339   :  { %1117 = vmatpush3.msra.mxu0 %v481_v25 }
 0x33a   :  { %1119 = vmatmul.mubr.msk.f32.vlgmr.msra.gmra.mxu0 %vm53_vm0, %v989_v26 }
 0x33b   :  { %1121 = vmatprep.mubr.msk.f32.mxu0 %vm53_vm0, %v990_v27 }
 0x33e   :  { %1122 = vmatmul.mubr.msk.f32.gmra.mxu0 %vm53_vm0, %v991_v28 }
 0x33f   :  { %1139 = vmatprep.mubr.msk.f32.mxu0 %vm53_vm0, %v1006_v47 }
 0x3fa   :  { %v1120_v31 = vpop.f32.mrf.mxu0 }
 0x3fb   :  { %v597_v38 = vadd.f32 %v1120_v31, %v501_v36 }
 0x3fc   :  { %v591_v33 = vpop.f32.mrf.mxu0 }
 0x3fd   :  { %v592_v42 = vadd.f32 %v591_v33, %v496_v41  ;;  %v611_v44 = vmax.f32 %v597_v38, 0.0 }
 0x3fe   :  { %v1123_v34 = vpop.f32.mrf.mxu0 }
 0x3ff   :  { %v607_v35 = vadd.f32 %v1123_v34, %v511_v30  ;;  %v610_v45 = vmax.f32 %v592_v42, 0.0 }
 0x400   :  { %v601_v37 = vpop.f32.mrf.mxu0 }
 0x401   :  { %v613_v39 = vmax.f32 %v607_v35, 0.0  ;;  %v602_v40 = vadd.f32 %v601_v37, %v506_v32 }
 0x403   :  { %v612_v43 = vmax.f32 %v602_v40, 0.0  ;;  %1124 = vmatprep.subr.mxu1 %v613_v39 }
 0x404   :  { %1125 = vmatpush3.msra.mxu1 %v613_v39 }
 0x405   :  { %1126 = vmatprep.subr.mxu1 %v612_v43 }
 0x406   :  { %1127 = vmatpush3.msra.mxu1 %v612_v43 }
 0x407   :  { %1128 = vmatprep.subr.mxu1 %v611_v44 }
 0x408   :  { %1129 = vmatpush3.msra.mxu1 %v611_v44 }
 0x409   :  { %1130 = vmatprep.subr.mxu1 %v610_v45 }
 0x40a   :  { %1131 = vmatpush3.msra.mxu1 %v610_v45 }
 0x40b   :  { %1133 = vmatmul.mubr.msk.f32.vlgmr.msra.gmra.mxu1 %vm169_vm1, %v1001_v46 }
 0x40c   :  { %1153 = vmatprep.mubr.msk.f32.mxu1 %vm169_vm1, %v1018_v59 }
 0x4cb   :  { %v1134_v49 = vpop.f32.mrf.mxu1 }
 0x4cc   :  { %v708_v50 = vadd.f32 %v1134_v49, %v628_v48 }
 0x4cd   :  { %v702_v52 = vpop.f32.mrf.mxu1 }
 0x4ce   :  { %v712_v53 = vadd.f32 %v708_v50, %v482_v23  ;;  %v703_v54 = vadd.f32 %v702_v52, %v623_v51  ;;  %v948_v23 = vpop.permute.xlu0 %947 }
 0x4d0   :  { %v711_v55 = vadd.f32 %v703_v54, %v481_v25  ;;  %1135 = vmatprep.subr.mxu0 %v712_v53 }
 0x4d1   :  { %1136 = vmatpush3.msra.mxu0 %v712_v53 }
 0x4d2   :  { %1137 = vmatprep.subr.mxu0 %v711_v55 }
 0x4d3   :  { %1138 = vmatpush3.msra.mxu0 %v711_v55 }
 0x4d4   :  { %1140 = vmatmul.mubr.msk.f32.vlgmr.msra.gmra.mxu0 %vm53_vm0, %v1007_v56 }
 0x4d5   :  { %1142 = vmatprep.mubr.msk.f32.mxu0 %vm53_vm0, %v1008_v57 }
 0x4d8   :  { %1143 = vmatmul.mubr.msk.f32.gmra.mxu0 %vm53_vm0, %v1009_v58 }
 0x594   :  { %v1141_v61 = vpop.f32.mrf.mxu0 }
 0x595   :  { %v827_v4 = vadd.f32 %v1141_v61, %v731_v2 }
 0x596   :  { %v821_v63 = vpop.f32.mrf.mxu0 }
 0x597   :  { %v822_v8 = vadd.f32 %v821_v63, %v726_v7  ;;  %v841_v10 = vmax.f32 %v827_v4, 0.0 }
 0x598   :  { %v1144_v0 = vpop.f32.mrf.mxu0 }
 0x599   :  { %v837_v1 = vadd.f32 %v1144_v0, %v741_v60  ;;  %v840_v11 = vmax.f32 %v822_v8, 0.0 }
 0x59a   :  { %v831_v3 = vpop.f32.mrf.mxu0 }
 0x59b   :  { %v843_v5 = vmax.f32 %v837_v1, 0.0  ;;  %v832_v6 = vadd.f32 %v831_v3, %v736_v62 }
 0x59d   :  { %v842_v9 = vmax.f32 %v832_v6, 0.0  ;;  %1145 = vmatprep.subr.mxu1 %v843_v5 }
 0x59e   :  { %1146 = vmatpush3.msra.mxu1 %v843_v5 }
 0x59f   :  { %1147 = vmatprep.subr.mxu1 %v842_v9 }
 0x5a0   :  { %1148 = vmatpush3.msra.mxu1 %v842_v9 }
 0x5a1   :  { %1149 = vmatprep.subr.mxu1 %v841_v10 }
 0x5a2   :  { %1150 = vmatpush3.msra.mxu1 %v841_v10 }
 0x5a3   :  { %1151 = vmatprep.subr.mxu1 %v840_v11 }
 0x5a4   :  { %1152 = vmatpush3.msra.mxu1 %v840_v11 }
 0x5a5   :  { %1154 = vmatmul.mubr.msk.f32.vlgmr.msra.gmra.mxu1 %vm169_vm1, %v1019_v12 }
 0x665   :  { %v1155_v15 = vpop.f32.mrf.mxu1 }
 0x666   :  { %v938_v16 = vadd.f32 %v1155_v15, %v858_v13 }
 0x667   :  { %v932_v17 = vpop.f32.mrf.mxu1 }
 0x668   :  { %v942_v18 = vadd.f32 %v938_v16, %v712_v53  ;;  %v933_v19 = vadd.f32 %v932_v17, %v853_v14 }
 0x66a   :  { %v956_v21 = vmul.f32 %v953_v20, %v942_v18  ;;  %v941_v22 = vadd.f32 %v933_v19, %v711_v55 }
 0x66c   :  { %959 = vst.msk [vmem:[%s1397_s6 + $0x8] sm:$0xff] %vm957_vm2, %v956_v21  ;;  %v955_v24 = vmul.f32 %v948_v23, %v941_v22 }
 0x66e   :  { %958 = vst.msk [vmem:[%s1397_s6] sm:$0xff] %vm957_vm2, %v955_v24 }

</bundles_post_ra>
